<compile_context>
chip_gen: v7x
topology: tpu7x:2x2x1
jax: 0.10.0
libtpu: 0.0.40
codegen_flags: <defaults>
</compile_context>

<pallas_src>
import functools

import jax
import jax.numpy as jnp
from jax.experimental import pallas as pl
from jax.experimental.pallas import tpu as pltpu


# ------------------------------ Pallas kernel -------------------------------

def pos_embed_kernel(x_ref, w_ref, b_ref, pe_ref, o_ref, *, scale):
    """Fused Positional_Embedding.forward, whole batch in one step.

    x_ref  : [N, L, Din]  raw input features
    w_ref  : [Din, D]     embedding Linear weight (x @ W orientation)
    b_ref  : [1, D]       embedding Linear bias
    pe_ref : [L, D]       positional encoding (windowed to seq length by
                          the BlockSpec)
    o_ref  : [N, L, D]    output
    """
    x = x_ref[...]                                   # [N, L, Din]
    w = w_ref[...]                                   # [Din, D]
    b = b_ref[...]                                   # [1, D]
    pe = pe_ref[...]                                 # [L, D]

    N, L, Din = x.shape
    D = w.shape[1]

    if Din == 1:
        # input_dim == 1: Linear is an outer product -> pure VPU broadcast
        # multiply; avoids a useless K=1 MXU matmul.
        y = x * w                                    # [N,L,1]*[1,D] -> [N,L,D]
    else:
        # Flatten (N, L) so the MXU sees one tall LHS instead of tiny
        # per-batch matmuls.
        y = jnp.dot(
            x.reshape(N * L, Din), w,
            preferred_element_type=jnp.float32,
        ).reshape(N, L, D)

    # module order: (x @ W + b) * sqrt(d_model) + pos_encoding (bcast over N)
    o_ref[...] = (y + b) * scale + pe[None, :, :]


# --------------------------------- wrapper ----------------------------------

def positional_encoding(length, d_model):
    """Matches the PyTorch helper: cat([sin, cos], -1) of position/rate grid."""
    depth = d_model // 2
    positions = jnp.arange(length, dtype=jnp.float32)[:, None]      # [L, 1]
    depths = jnp.arange(depth, dtype=jnp.float32)[None, :] / depth  # [1, D/2]
    angle_rates = 1.0 / (10000.0 ** depths)
    angle_rads = positions * angle_rates                            # [L, D/2]
    return jnp.concatenate([jnp.sin(angle_rads), jnp.cos(angle_rads)], axis=-1)


def positional_embedding(x, w, b, pos_enc, d_model):
    N, L, Din = x.shape
    D = w.shape[1]
    max_len = pos_enc.shape[0]
    assert L <= max_len, f"seq len {L} exceeds positional table {max_len}"
    scale = float(d_model) ** 0.5

    return pl.pallas_call(
        functools.partial(pos_embed_kernel, scale=scale),
        out_shape=jax.ShapeDtypeStruct((N, L, D), jnp.float32),
        grid=(1,),  # single step: whole problem is one block (~KiB scale)
        in_specs=[
            pl.BlockSpec((N, L, Din), lambda i: (0, 0, 0)),   # x (full)
            pl.BlockSpec((Din, D), lambda i: (0, 0)),         # W
            pl.BlockSpec((1, D), lambda i: (0, 0)),           # b
            pl.BlockSpec((L, D), lambda i: (0, 0)),           # pos_enc[:L]
        ],
        out_specs=pl.BlockSpec((N, L, D), lambda i: (0, 0, 0)),
        compiler_params=pltpu.CompilerParams(
            dimension_semantics=("arbitrary",)),
    )(x, w, b, pos_enc)


# --------------------------- pure-JAX reference ------------------------------

def reference(x, w, b, pos_enc, d_model):
    L = x.shape[-2]
    y = (x @ w + b) * (d_model ** 0.5)
    return y + pos_enc[:L, :][None, :, :]


# ----------------------------------- main ------------------------------------

if __name__ == "__main__":
    # small shapes consistent with the module: batch=2, seq=16, input_dim=1,
    # d_model=256 (matches spec; multiple of 128 -> lane-dense), max_len=64
    N, L, input_dim, d_model, max_len = 2, 16, 1, 256, 64

    key = jax.random.PRNGKey(0)
    k_x, k_w, k_b = jax.random.split(key, 3)

    x = jax.random.normal(k_x, (N, L, input_dim), jnp.float32)
    # nn.Linear-like init, stored in x @ W orientation (PyTorch weight.T)
    w = jax.random.normal(k_w, (input_dim, d_model), jnp.float32) / (input_dim ** 0.5)
    b = jax.random.normal(k_b, (1, d_model), jnp.float32) * 0.02
    pos_enc = positional_encoding(max_len, d_model)

    out = positional_embedding(x, w, b, pos_enc, d_model)
    out = jax.block_until_ready(out)

    assert out.shape == (N, L, d_model)
    assert bool(jnp.all(jnp.isfinite(out)))

    ref = jax.block_until_ready(reference(x, w, b, pos_enc, d_model))
    max_err = float(jnp.max(jnp.abs(out - ref)))
    assert max_err < 1e-4, f"mismatch vs reference: max abs err = {max_err}"

    print("KERNEL_OK")
</pallas_src>

<mosaic_0001>
module attributes {stable_mosaic.version = 11 : i64} {
  func.func @pos_embed_kernel(%arg0: i32, %arg1: memref<2x16x1xf32, #tpu.memory_space<vmem>>, %arg2: memref<1x256xf32, #tpu.memory_space<vmem>>, %arg3: memref<1x256xf32, #tpu.memory_space<vmem>>, %arg4: memref<16x256xf32, #tpu.memory_space<vmem>>, %arg5: memref<2x16x256xf32, #tpu.memory_space<vmem>>) attributes {dimension_semantics = [#tpu.dimension_semantics<arbitrary>], iteration_bounds = array<i64: 1>, scalar_prefetch = 0 : i64, scratch_operands = 0 : i64, tpu.core_type = #tpu.core_type<tc>, window_params = [{pipeline_mode = #tpu.pipeline_mode<synchronous>, transform_indices = @transform_0, window_bounds = array<i64: 2, 16, 1>}, {pipeline_mode = #tpu.pipeline_mode<synchronous>, transform_indices = @transform_1, window_bounds = array<i64: 1, 256>}, {pipeline_mode = #tpu.pipeline_mode<synchronous>, transform_indices = @transform_2, window_bounds = array<i64: 1, 256>}, {transform_indices = @transform_3, window_bounds = array<i64: 16, 256>}, {pipeline_mode = #tpu.pipeline_mode<synchronous>, transform_indices = @transform_4, window_bounds = array<i64: 2, 16, 256>}]} {
    %c0 = arith.constant 0 : index
    %c0_0 = arith.constant 0 : index
    %c0_1 = arith.constant 0 : index
    %0 = vector.load %arg1[%c0, %c0_0, %c0_1] : memref<2x16x1xf32, #tpu.memory_space<vmem>>, vector<2x16x1xf32>
    %c0_2 = arith.constant 0 : index
    %c0_3 = arith.constant 0 : index
    %1 = vector.load %arg2[%c0_2, %c0_3] : memref<1x256xf32, #tpu.memory_space<vmem>>, vector<1x256xf32>
    %c0_4 = arith.constant 0 : index
    %c0_5 = arith.constant 0 : index
    %2 = vector.load %arg3[%c0_4, %c0_5] : memref<1x256xf32, #tpu.memory_space<vmem>>, vector<1x256xf32>
    %c0_6 = arith.constant 0 : index
    %c0_7 = arith.constant 0 : index
    %3 = vector.load %arg4[%c0_6, %c0_7] : memref<16x256xf32, #tpu.memory_space<vmem>>, vector<16x256xf32>
    %4 = vector.shape_cast %1 : vector<1x256xf32> to vector<1x1x256xf32>
    %5 = vector.broadcast %0 : vector<2x16x1xf32> to vector<2x16x256xf32>
    %6 = vector.broadcast %4 : vector<1x1x256xf32> to vector<2x16x256xf32>
    %7 = arith.mulf %5, %6 : vector<2x16x256xf32>
    %8 = vector.shape_cast %2 : vector<1x256xf32> to vector<1x1x256xf32>
    %9 = vector.broadcast %8 : vector<1x1x256xf32> to vector<2x16x256xf32>
    %10 = arith.addf %7, %9 : vector<2x16x256xf32>
    %cst = arith.constant 1.600000e+01 : f32
    %11 = vector.broadcast %cst : f32 to vector<2x16x256xf32>
    %12 = arith.mulf %10, %11 : vector<2x16x256xf32>
    %13 = vector.shape_cast %3 : vector<16x256xf32> to vector<1x16x256xf32>
    %14 = vector.broadcast %13 : vector<1x16x256xf32> to vector<2x16x256xf32>
    %15 = arith.addf %12, %14 : vector<2x16x256xf32>
    %c0_8 = arith.constant 0 : index
    %c0_9 = arith.constant 0 : index
    %c0_10 = arith.constant 0 : index
    %16 = vector.load %arg5[%c0_8, %c0_9, %c0_10] : memref<2x16x256xf32, #tpu.memory_space<vmem>>, vector<2x16x256xf32>
    tpu.vector_store %arg5[%c0_8, %c0_9, %c0_10], %15 {strides = array<i32>} : memref<2x16x256xf32, #tpu.memory_space<vmem>>, vector<2x16x256xf32>,
    return
  }
  func.func @transform_0(%arg0: i32) -> (i32, i32, i32) {
    %c0_i32 = arith.constant 0 : i32
    %c0_i32_0 = arith.constant 0 : i32
    %c0_i32_1 = arith.constant 0 : i32
    %c0_i32_2 = arith.constant 0 : i32
    return %c0_i32, %c0_i32_0, %c0_i32_1 : i32, i32, i32
  }
  func.func @transform_1(%arg0: i32) -> (i32, i32) {
    %c0_i32 = arith.constant 0 : i32
    %c0_i32_0 = arith.constant 0 : i32
    %c0_i32_1 = arith.constant 0 : i32
    return %c0_i32, %c0_i32_0 : i32, i32
  }
  func.func @transform_2(%arg0: i32) -> (i32, i32) {
    %c0_i32 = arith.constant 0 : i32
    %c0_i32_0 = arith.constant 0 : i32
    %c0_i32_1 = arith.constant 0 : i32
    return %c0_i32, %c0_i32_0 : i32, i32
  }
  func.func @transform_3(%arg0: i32) -> (i32, i32) {
    %c0_i32 = arith.constant 0 : i32
    %c0_i32_0 = arith.constant 0 : i32
    %c0_i32_1 = arith.constant 0 : i32
    return %c0_i32, %c0_i32_0 : i32, i32
  }
  func.func @transform_4(%arg0: i32) -> (i32, i32, i32) {
    %c0_i32 = arith.constant 0 : i32
    %c0_i32_0 = arith.constant 0 : i32
    %c0_i32_1 = arith.constant 0 : i32
    %c0_i32_2 = arith.constant 0 : i32
    return %c0_i32, %c0_i32_0, %c0_i32_1 : i32, i32, i32
  }
}

</mosaic_0001>

<bundles_post_ra>
// kernel: tpu_custom_call.1
= control target key start
LH: loop header
LB: loop body
LE: loop exit
PB: predicated region body
PF: predicated region fallthrough
CT: control target
= control target key end

     0   :  { %9 = vsyncpa [#allocation3], 0  ;;  %s277_s0 = inlined_call_operand.vmem [shape: f32[2,16,1], index: 0, kind: input, shape index: {}]   ;;  %s278_s1 = inlined_call_operand.vmem [shape: f32[1,256], index: 1, kind: input, shape index: {}]   ;;  %s279_s2 = inlined_call_operand.vmem [shape: f32[1,256], index: 2, kind: input, shape index: {}]   ;;  %s280_s3 = inlined_call_operand.hbm [shape: f32[64,256], index: 3, kind: input, shape index: {}]   ;;  %s281_s4 = inlined_call_operand.hbm [shape: f32[2,16,256], index: 4, kind: output, shape index: {}]  }
   0x1   :  { %10 = vsyncpa [#allocation4], 0  ;;  %s196_s15 = smov [#allocation2]   ;;  %s148_s19 = scalar_lea.hbm %s280_s3, 512 }
   0x2   :  { %s22_s16 = sshll.u32 %s196_s15, 4  ;;  %p149_p0 = scmp.ne.s32.totalorder %s280_s3, %s148_s19  ;;  %s23_s16 = int_to_ptr.vmem [resolvable:$true] %s22_s16 }
   0x3   :  { %s150_s24 = scalar_lea.hbm %s280_s3, 2048  ;;  %p152_p2 = scmp.lt.u32.totalorder %s148_s19, %s280_s3 }
   0x4   :  { %p151_p1 = scmp.lt.u32.totalorder %s150_s24, %s148_s19 }
   0x6   :  { %p153_p3 = por %p152_p2, %p151_p1 }
   0x8   :  { %p154_p4 = pnand %p153_p3, %p149_p0 }
   0xa   :  { %157 = shalt.err (!%p154_p4)
}
   0xb   :  { %s158_s27 = scalar_lea.vmem %s23_s16, 512  ;;  %p163_p6 = scmp.lt.s32.totalorder %s23_s16, %s23_s16 }
   0xc   :  { %p159_p5 = scmp.ne.s32.totalorder %s23_s16, %s158_s27  ;;  %p164_p7 = scmp.lt.s32.totalorder %s158_s27, %s158_s27 }
   0xe   :  { %p165_p8 = por %p164_p7, %p163_p6 }
  0x10   :  { %p166_p9 = pnand %p165_p8, %p159_p5 }
  0x12   :  { %169 = shalt.err (!%p166_p9)
}
  0x13   :  { %s197_s28 = smov 256   ;;  %s198_s29 = smov 16  }
  0x14   :  { %28 = dma.hbm_to_vmem [thread:$0]  %s280_s3, 512, %s23_s16, [#allocation3], %s197_s28, %s197_s28, %s198_s29  }
  0x15   :  { %192 = dma.done.wait [#allocation3], 512  }
  0x16   :  { %193 = vsyncadd [#allocation3], 4294966784  ;;  %v199_v0 = vmov 0   ;;  %v34_v1 = vld [vmem:[%s277_s0 + $0x10] sm:$0xff]  ;;  %v32_v2 = vld [vmem:[%s277_s0] sm:$0xff]  ;;  %v63_v5 = vlaneseq }
  0x17   :  { %147 = vset.pattern.permute.xlu1 %v199_v0  ;;  %146 = vset.pattern.permute.xlu0 %v199_v0  ;;  %v35_v3 = vld [vmem:[%s277_s0 + $0x18] sm:$0xff]  ;;  %v33_v4 = vld [vmem:[%s277_s0 + $0x8] sm:$0xff]  ;;  %v36_v9 = vld [vmem:[%s278_s1] sm:$0x3]  ;;  %s200_s0 = smov [#allocation5]  }
  0x18   :  { %54 = vperm.xlu1 %147, %v34_v1   ;;  %44 = vperm.xlu0 %146, %v32_v2   ;;  %v64_v6 = vshrl.u32 %v63_v5, 7  ;;  %v37_v10 = vld [vmem:[%s279_s2] sm:$0x3]  ;;  %v38_v25 = vld [vmem:[#allocation2] sm:$0xff]  ;;  %v39_v26 = vld [vmem:[#allocation2 + $0x8] sm:$0xff]  ;;  %s129_s1 = sshll.u32 %s200_s0, 4  ;;  %s130_s1 = int_to_ptr.vmem [resolvable:$true] %s129_s1 }
  0x19   :  { %v40_v45 = vld [vmem:[#allocation2 + $0x10] sm:$0xff]  ;;  %v41_v46 = vld [vmem:[#allocation2 + $0x18] sm:$0xff]  ;;  %s170_s2 = scalar_lea.vmem %s130_s1, 1024  ;;  %p175_p11 = scmp.lt.s32.totalorder %s130_s1, %s130_s1 }
  0x1a   :  { %v65_v7 = vsub.s32 0, %v64_v6  ;;  %v69_v8 = vsub.s32 1, %v64_v6  ;;  %p171_p10 = scmp.ne.s32.totalorder %s130_s1, %s170_s2  ;;  %p176_p12 = scmp.lt.s32.totalorder %s170_s2, %s170_s2 }
  0x1c   :  { %59 = vperm.xlu1 %147, %v35_v3   ;;  %49 = vperm.xlu0 %146, %v33_v4   ;;  %v66_v11 = vrot.slane %v36_v9, %v65_v7  ;;  %v70_v12 = vrot.slane %v36_v9, %v69_v8  ;;  %v85_v13 = vrot.slane %v37_v10, %v65_v7  ;;  %p177_p13 = por %p176_p12, %p175_p11 }
  0x1d   :  { %v89_v14 = vrot.slane %v37_v10, %v69_v8 }
  0x1e   :  { %p178_p0 = pnand %p177_p13, %p171_p10 }
  0x97   :  { %v55_v15 = vpop.permute.xlu1 %54  ;;  %v45_v16 = vpop.permute.xlu0 %44 }
  0x98   :  { %v77_v17 = vmul.f32 %v66_v11, %v55_v15  ;;  %v78_v18 = vmul.f32 %v70_v12, %v55_v15  ;;  %v73_v19 = vmul.f32 %v66_v11, %v45_v16  ;;  %v74_v20 = vmul.f32 %v70_v12, %v45_v16 }
  0x9a   :  { %v96_v21 = vadd.f32 %v85_v13, %v77_v17  ;;  %v97_v22 = vadd.f32 %v89_v14, %v78_v18  ;;  %v92_v23 = vadd.f32 %v85_v13, %v73_v19  ;;  %v93_v24 = vadd.f32 %v89_v14, %v74_v20 }
  0x9b   :  { %v60_v27 = vpop.permute.xlu1 %59  ;;  %v50_v28 = vpop.permute.xlu0 %49 }
  0x9c   :  { %v104_v29 = vmul.f32 16.0, %v96_v21  ;;  %v105_v30 = vmul.f32 16.0, %v97_v22  ;;  %v100_v31 = vmul.f32 16.0, %v92_v23  ;;  %v101_v32 = vmul.f32 16.0, %v93_v24 }
  0x9d   :  { %v79_v33 = vmul.f32 %v66_v11, %v60_v27  ;;  %v80_v34 = vmul.f32 %v70_v12, %v60_v27  ;;  %v75_v35 = vmul.f32 %v66_v11, %v50_v28  ;;  %v76_v36 = vmul.f32 %v70_v12, %v50_v28 }
  0x9e   :  { %v112_v37 = vadd.f32 %v104_v29, %v38_v25  ;;  %v113_v38 = vadd.f32 %v105_v30, %v39_v26  ;;  %v108_v39 = vadd.f32 %v100_v31, %v38_v25  ;;  %v109_v40 = vadd.f32 %v101_v32, %v39_v26 }
  0x9f   :  { %v98_v41 = vadd.f32 %v85_v13, %v79_v33  ;;  %v99_v42 = vadd.f32 %v89_v14, %v80_v34  ;;  %v94_v43 = vadd.f32 %v85_v13, %v75_v35  ;;  %v95_v44 = vadd.f32 %v89_v14, %v76_v36 }
  0xa0   :  { %120 = vst [vmem:[#allocation5 + $0x20] sm:$0xff] %v112_v37  ;;  %121 = vst [vmem:[#allocation5 + $0x28] sm:$0xff] %v113_v38 }
  0xa1   :  { %116 = vst [vmem:[#allocation5] sm:$0xff] %v108_v39  ;;  %117 = vst [vmem:[#allocation5 + $0x8] sm:$0xff] %v109_v40  ;;  %v106_v47 = vmul.f32 16.0, %v98_v41  ;;  %v107_v48 = vmul.f32 16.0, %v99_v42  ;;  %v102_v49 = vmul.f32 16.0, %v94_v43  ;;  %v103_v50 = vmul.f32 16.0, %v95_v44 }
  0xa3   :  { %v114_v51 = vadd.f32 %v106_v47, %v40_v45  ;;  %v115_v52 = vadd.f32 %v107_v48, %v41_v46  ;;  %v110_v53 = vadd.f32 %v102_v49, %v40_v45  ;;  %v111_v54 = vadd.f32 %v103_v50, %v41_v46 }
  0xa5   :  { %122 = vst [vmem:[#allocation5 + $0x30] sm:$0xff] %v114_v51  ;;  %123 = vst [vmem:[#allocation5 + $0x38] sm:$0xff] %v115_v52 }
  0xa6   :  { %118 = vst [vmem:[#allocation5 + $0x10] sm:$0xff] %v110_v53  ;;  %119 = vst [vmem:[#allocation5 + $0x18] sm:$0xff] %v111_v54 }
  0xa7   :  { %181 = shalt.err (!%p178_p0)
}
  0xa8   :  { %s182_s19 = scalar_lea.hbm %s281_s4, 1024 }
  0xa9   :  { %p183_p1 = scmp.ne.s32.totalorder %s281_s4, %s182_s19  ;;  %p186_p2 = scmp.lt.u32.totalorder %s182_s19, %s281_s4 }
  0xab   :  { %p188_p3 = pnand %p186_p2, %p183_p1 }
  0xad   :  { %191 = shalt.err (!%p188_p3)
}
  0xae   :  { %135 = dma.vmem_to_hbm [thread:$0]  %s130_s1, 1024, %s281_s4, [#allocation4], %s197_s28, %s197_s28, %s198_s29  }
  0xaf   :  { %194 = dma.done.wait [#allocation4], 1024  }
  0xb0   :  { %195 = vsyncadd [#allocation4], 4294966272 }
  0xb1   :  { %139 = vsyncpa [#allocation3], 1 }
  0xb2   :  { %140 = vsyncpa [#allocation4], 1 }

</bundles_post_ra>
